<compile_context>
chip_gen: v6e
topology: v6e:2x2x1
jax: 0.10.0
libtpu: 0.0.40
codegen_flags: <defaults>
</compile_context>

<pallas_src>
import functools
import math

import jax
import jax.numpy as jnp
from jax import lax
from jax.experimental import pallas as pl
from jax.experimental.pallas import tpu as pltpu


def _softplus(x):
    # Numerically stable softplus, same math as torch.nn.Softplus (beta=1).
    return jnp.logaddexp(x, 0.0)


def _round_up(n, m):
    return ((n + m - 1) // m) * m


def _choose_batch_tile(B, batch_tile):
    """Batch tile: multiple of 8 sublanes, big enough to amortize per-step overhead,
    and split in two when a single tile would cover a non-tiny batch (2 TCs on v7x)."""
    full = _round_up(B, 8)
    TB = min(batch_tile, full)
    if TB >= full and B > 8:
        TB = _round_up((B + 1) // 2, 8)
    B_pad = _round_up(B, TB)
    return TB, B_pad


def fused_lip_mlp_kernel(x_ref, b_ref, *refs, num_layers, out_pads):
    """Whole CondLipMLP stack on one batch tile.

    Args:
      x_ref:  VMEM (TB, D0_pad) bf16 input activations (x|z concatenated, zero-padded).
      b_ref:  VMEM (num_layers, max_out_pad) f32 packed biases.
      refs:   (w_0, ..., w_{L-1}, o_ref). w_i is (Dout_pad_i, Din_pad_i) bf16 with the
              Lipschitz scale already folded in; o_ref is (TB, Dlast_pad) f32.
    """
    o_ref = refs[-1]
    h = x_ref[...]                                            # (TB, in_pad) bf16

    for li in range(num_layers):
        w = refs[li][...]                                     # (out_pad, in_pad) bf16
        o_p = out_pads[li]

        # y = h @ w.T without materializing the transpose:
        # contract h axis 1 with w axis 1 -> feeds the MXU directly, bf16 in, f32 accumulate.
        y = lax.dot_general(
            h.astype(jnp.bfloat16), w,
            dimension_numbers=(((1,), (1,)), ((), ())),
            preferred_element_type=jnp.float32,
        )
        y = y + b_ref[li:li + 1, :o_p]                        # f32 bias add (VPU)

        if li < num_layers - 1:
            h = _softplus(y)                                  # f32 Softplus (EUP)
        else:
            h = y

    o_ref[...] = h.astype(o_ref.dtype)


def cond_lip_mlp_forward(x, z, params, *, batch_tile=512):
    """CondLipMLP.forward: concat(x, z) on last dim, then the fused LipschitzLinear stack."""
    B = x.shape[0]
    dx, dz = x.shape[-1], z.shape[-1]
    d_in = dx + dz
    num_layers = len(params)

    dims = [d_in] + [w.shape[0] for (w, _, _) in params]
    dims_p = [_round_up(d, 128) for d in dims]                # lane-dense feature dims
    max_out_pad = max(dims_p[1:])

    # ---- Hoisted Lipschitz rescale (one-time, tiny; all in f32, same math as PyTorch) ----
    w_list, b_rows = [], []
    for li, (w, b, c) in enumerate(params):
        lipc = _softplus(c.reshape(())).astype(jnp.float32)
        scale = jnp.minimum(lipc / jnp.sum(jnp.abs(w), axis=1), 1.0)
        w_scaled = w.astype(jnp.float32) * scale[:, None]
        o_p, i_p = dims_p[li + 1], dims_p[li]
        w_p = (jnp.zeros((o_p, i_p), jnp.bfloat16)
               .at[:w.shape[0], :w.shape[1]].set(w_scaled.astype(jnp.bfloat16)))
        w_list.append(w_p)
        b_rows.append(jnp.zeros((max_out_pad,), jnp.float32).at[:b.shape[0]].set(b))
    b_all = jnp.stack(b_rows, axis=0)                         # (num_layers, max_out_pad) f32

    # ---- Batch tiling ----
    TB, B_pad = _choose_batch_tile(B, batch_tile)

    # ---- Fused concat + lane/batch pad: one padded bf16 buffer, no intermediate concat copy ----
    x_p = (jnp.zeros((B_pad, dims_p[0]), jnp.bfloat16)
           .at[:B, :dx].set(x.astype(jnp.bfloat16))
           .at[:B, dx:d_in].set(z.astype(jnp.bfloat16)))

    in_specs = [
        # Batch-tiled input activations.
        pl.BlockSpec((TB, dims_p[0]), lambda i: (i, 0),
                     memory_space=pltpu.MemorySpace.VMEM),
        # All biases packed into one small VMEM tile, constant block index -> VMEM-resident.
        pl.BlockSpec((num_layers, max_out_pad), lambda i: (0, 0),
                     memory_space=pltpu.MemorySpace.VMEM),
    ]
    for li in range(num_layers):
        o_p, i_p = dims_p[li + 1], dims_p[li]
        # Constant block index -> weights stay VMEM-resident across batch tiles.
        in_specs.append(pl.BlockSpec((o_p, i_p), lambda i: (0, 0),
                                     memory_space=pltpu.MemorySpace.VMEM))

    out_spec = pl.BlockSpec((TB, dims_p[-1]), lambda i: (i, 0),
                            memory_space=pltpu.MemorySpace.VMEM)

    # Explicit VMEM budget with headroom. NOTE: the constant-index weight/bias blocks could be
    # single-buffered (pipeline_mode=pl.Buffered(1)) if the layer stack ever grows near v7x's
    # 64 MiB VMEM; at these sizes the default double-buffering is negligible.
    vmem_bytes = (2 * TB * dims_p[0] * 2                      # x tile, bf16, double-buffered
                  + 2 * TB * dims_p[-1] * 4                   # out tile, f32, double-buffered
                  + 2 * num_layers * max_out_pad * 4          # packed biases
                  + sum(2 * dims_p[li + 1] * dims_p[li] * 2 for li in range(num_layers)))
    vmem_limit = int(min(max(4 * vmem_bytes + (1 << 20), 16 << 20), 48 << 20))

    kernel = functools.partial(fused_lip_mlp_kernel,
                               num_layers=num_layers, out_pads=tuple(dims_p[1:]))
    out_p = pl.pallas_call(
        kernel,
        out_shape=jax.ShapeDtypeStruct((B_pad, dims_p[-1]), jnp.float32),
        grid=(B_pad // TB,),
        in_specs=in_specs,
        out_specs=out_spec,
        compiler_params=pltpu.CompilerParams(
            # Batch tiles are independent -> sharded across both TCs on v7x.
            dimension_semantics=("parallel",),
            vmem_limit_bytes=vmem_limit,
        ),
    )(x_p, b_all, *w_list)

    # Strip batch + lane padding.
    return out_p[:B, : dims[-1]]


def init_cond_lip_mlp_params(layers, key):
    """Deterministic init mirroring LipschitzLinear.initialize_parameters:
       W ~ U(-1/sqrt(in), 1/sqrt(in)), bias ~ U(-stdv, stdv), c = max_row sum(|W|)."""
    params = []
    for i in range(len(layers) - 1):
        in_f, out_f = layers[i], layers[i + 1]
        key, kw, kb = jax.random.split(key, 3)
        stdv = 1.0 / math.sqrt(in_f)
        w = jax.random.uniform(kw, (out_f, in_f), jnp.float32, -stdv, stdv)
        b = jax.random.uniform(kb, (out_f,), jnp.float32, -stdv, stdv)
        c = jnp.max(jnp.abs(w).sum(axis=1)).reshape(1)
        params.append((w, b, c))
    return params


def cond_lip_mlp_reference(x, z, params):
    """Pure-JAX f32 reference (same math as the PyTorch module) for validation."""
    h = jnp.concatenate([x, z], axis=-1)
    n = len(params)
    for i, (w, b, c) in enumerate(params):
        lipc = _softplus(c[0])
        scale = jnp.minimum(lipc / jnp.abs(w).sum(axis=1), 1.0)
        h = h @ (w * scale[:, None]).T + b
        if i < n - 1:
            h = _softplus(h)
    return h


if __name__ == "__main__":
    key = jax.random.PRNGKey(0)
    kx, kz, kp = jax.random.split(key, 3)

    B = 8                      # batch
    x_dim, z_dim = 3, 5        # concatenated input dim = 8
    layers = [x_dim + z_dim, 32, 32, 4]

    x = jax.random.normal(kx, (B, x_dim), jnp.float32)
    z = jax.random.normal(kz, (B, z_dim), jnp.float32)
    params = init_cond_lip_mlp_params(layers, kp)

    out = cond_lip_mlp_forward(x, z, params)
    out = jax.block_until_ready(out)

    ref = cond_lip_mlp_reference(x, z, params)
    assert out.shape == (B, layers[-1]), out.shape
    # bf16 matmul operands (f32 accumulate) -> compare against the f32 reference with a
    # bf16-appropriate tolerance.
    assert jnp.allclose(out, ref, atol=2e-2, rtol=2e-2), "mismatch vs reference"

    print("KERNEL_OK")
</pallas_src>

<mosaic_0001>
module attributes {stable_mosaic.version = 11 : i64} {
  func.func @fused_lip_mlp_kernel(%arg0: i32, %arg1: memref<8x128xbf16, #tpu.memory_space<vmem>>, %arg2: memref<3x128xf32, #tpu.memory_space<vmem>>, %arg3: memref<128x128xbf16, #tpu.memory_space<vmem>>, %arg4: memref<128x128xbf16, #tpu.memory_space<vmem>>, %arg5: memref<128x128xbf16, #tpu.memory_space<vmem>>, %arg6: memref<8x128xf32, #tpu.memory_space<vmem>>) attributes {dimension_semantics = [#tpu.dimension_semantics<parallel>], iteration_bounds = array<i64: 1>, scalar_prefetch = 0 : i64, scratch_operands = 0 : i64, tpu.core_type = #tpu.core_type<tc>, window_params = [{transform_indices = @transform_0, window_bounds = array<i64: 8, 128>}, {pipeline_mode = #tpu.pipeline_mode<synchronous>, transform_indices = @transform_1, window_bounds = array<i64: 3, 128>}, {pipeline_mode = #tpu.pipeline_mode<synchronous>, transform_indices = @transform_2, window_bounds = array<i64: 128, 128>}, {pipeline_mode = #tpu.pipeline_mode<synchronous>, transform_indices = @transform_3, window_bounds = array<i64: 128, 128>}, {pipeline_mode = #tpu.pipeline_mode<synchronous>, transform_indices = @transform_4, window_bounds = array<i64: 128, 128>}, {transform_indices = @transform_5, window_bounds = array<i64: 8, 128>}]} {
    %c0 = arith.constant 0 : index
    %c0_0 = arith.constant 0 : index
    %0 = vector.load %arg1[%c0, %c0_0] : memref<8x128xbf16, #tpu.memory_space<vmem>>, vector<8x128xbf16>
    %c0_1 = arith.constant 0 : index
    %c0_2 = arith.constant 0 : index
    %1 = vector.load %arg3[%c0_1, %c0_2] : memref<128x128xbf16, #tpu.memory_space<vmem>>, vector<128x128xbf16>
    %cst = arith.constant dense<0.000000e+00> : vector<8x128xf32>
    %2 = tpu.matmul %0, %1, %cst {dimension_numbers = #tpu.dot_dimension_numbers<[1], [1], [0], [0], [0, 0, 1, 0], [], []>} : vector<8x128xbf16>, vector<128x128xbf16>, vector<8x128xf32> -> vector<8x128xf32>
    %c0_3 = arith.constant 0 : index
    %c0_4 = arith.constant 0 : index
    %3 = vector.load %arg2[%c0_3, %c0_4] : memref<3x128xf32, #tpu.memory_space<vmem>>, vector<1x128xf32>
    %4 = vector.broadcast %3 : vector<1x128xf32> to vector<8x128xf32>
    %5 = arith.addf %2, %4 : vector<8x128xf32>
    %cst_5 = arith.constant 0.000000e+00 : f32
    %6 = vector.broadcast %cst_5 : f32 to vector<8x128xf32>
    %7 = arith.maximumf %5, %6 : vector<8x128xf32>
    %8 = vector.broadcast %cst_5 : f32 to vector<8x128xf32>
    %9 = arith.subf %5, %8 : vector<8x128xf32>
    %10 = arith.cmpf one, %9, %9 : vector<8x128xf32>
    %11 = vector.broadcast %cst_5 : f32 to vector<8x128xf32>
    %12 = arith.addf %5, %11 : vector<8x128xf32>
    %13 = math.absf %9 : vector<8x128xf32>
    %cst_6 = arith.constant 0.000000e+00 : f32
    %14 = vector.broadcast %cst_6 : f32 to vector<8x128xf32>
    %15 = arith.subf %14, %13 : vector<8x128xf32>
    %16 = math.exp %15 : vector<8x128xf32>
    %17 = math.log1p %16 : vector<8x128xf32>
    %18 = arith.addf %7, %17 : vector<8x128xf32>
    %19 = arith.select %10, %12, %18 : vector<8x128xi1>, vector<8x128xf32>
    %c0_7 = arith.constant 0 : index
    %c0_8 = arith.constant 0 : index
    %20 = vector.load %arg4[%c0_7, %c0_8] : memref<128x128xbf16, #tpu.memory_space<vmem>>, vector<128x128xbf16>
    %21 = arith.truncf %19 : vector<8x128xf32> to vector<8x128xbf16>
    %cst_9 = arith.constant dense<0.000000e+00> : vector<8x128xf32>
    %22 = tpu.matmul %21, %20, %cst_9 {dimension_numbers = #tpu.dot_dimension_numbers<[1], [1], [0], [0], [0, 0, 1, 0], [], []>} : vector<8x128xbf16>, vector<128x128xbf16>, vector<8x128xf32> -> vector<8x128xf32>
    %c1 = arith.constant 1 : index
    %c0_10 = arith.constant 0 : index
    %23 = vector.load %arg2[%c1, %c0_10] : memref<3x128xf32, #tpu.memory_space<vmem>>, vector<1x128xf32>
    %24 = vector.broadcast %23 : vector<1x128xf32> to vector<8x128xf32>
    %25 = arith.addf %22, %24 : vector<8x128xf32>
    %cst_11 = arith.constant 0.000000e+00 : f32
    %26 = vector.broadcast %cst_11 : f32 to vector<8x128xf32>
    %27 = arith.maximumf %25, %26 : vector<8x128xf32>
    %28 = vector.broadcast %cst_11 : f32 to vector<8x128xf32>
    %29 = arith.subf %25, %28 : vector<8x128xf32>
    %30 = arith.cmpf one, %29, %29 : vector<8x128xf32>
    %31 = vector.broadcast %cst_11 : f32 to vector<8x128xf32>
    %32 = arith.addf %25, %31 : vector<8x128xf32>
    %33 = math.absf %29 : vector<8x128xf32>
    %cst_12 = arith.constant 0.000000e+00 : f32
    %34 = vector.broadcast %cst_12 : f32 to vector<8x128xf32>
    %35 = arith.subf %34, %33 : vector<8x128xf32>
    %36 = math.exp %35 : vector<8x128xf32>
    %37 = math.log1p %36 : vector<8x128xf32>
    %38 = arith.addf %27, %37 : vector<8x128xf32>
    %39 = arith.select %30, %32, %38 : vector<8x128xi1>, vector<8x128xf32>
    %c0_13 = arith.constant 0 : index
    %c0_14 = arith.constant 0 : index
    %40 = vector.load %arg5[%c0_13, %c0_14] : memref<128x128xbf16, #tpu.memory_space<vmem>>, vector<128x128xbf16>
    %41 = arith.truncf %39 : vector<8x128xf32> to vector<8x128xbf16>
    %cst_15 = arith.constant dense<0.000000e+00> : vector<8x128xf32>
    %42 = tpu.matmul %41, %40, %cst_15 {dimension_numbers = #tpu.dot_dimension_numbers<[1], [1], [0], [0], [0, 0, 1, 0], [], []>} : vector<8x128xbf16>, vector<128x128xbf16>, vector<8x128xf32> -> vector<8x128xf32>
    %c2 = arith.constant 2 : index
    %c0_16 = arith.constant 0 : index
    %43 = vector.load %arg2[%c2, %c0_16] : memref<3x128xf32, #tpu.memory_space<vmem>>, vector<1x128xf32>
    %44 = vector.broadcast %43 : vector<1x128xf32> to vector<8x128xf32>
    %45 = arith.addf %42, %44 : vector<8x128xf32>
    %c0_17 = arith.constant 0 : index
    %c0_18 = arith.constant 0 : index
    %46 = vector.load %arg6[%c0_17, %c0_18] : memref<8x128xf32, #tpu.memory_space<vmem>>, vector<8x128xf32>
    tpu.vector_store %arg6[%c0_17, %c0_18], %45 {strides = array<i32>} : memref<8x128xf32, #tpu.memory_space<vmem>>, vector<8x128xf32>,
    return
  }
  func.func @transform_0(%arg0: i32) -> (i32, i32) {
    %c0_i32 = arith.constant 0 : i32
    %c0_i32_0 = arith.constant 0 : i32
    return %arg0, %c0_i32 : i32, i32
  }
  func.func @transform_1(%arg0: i32) -> (i32, i32) {
    %c0_i32 = arith.constant 0 : i32
    %c0_i32_0 = arith.constant 0 : i32
    %c0_i32_1 = arith.constant 0 : i32
    return %c0_i32, %c0_i32_0 : i32, i32
  }
  func.func @transform_2(%arg0: i32) -> (i32, i32) {
    %c0_i32 = arith.constant 0 : i32
    %c0_i32_0 = arith.constant 0 : i32
    %c0_i32_1 = arith.constant 0 : i32
    return %c0_i32, %c0_i32_0 : i32, i32
  }
  func.func @transform_3(%arg0: i32) -> (i32, i32) {
    %c0_i32 = arith.constant 0 : i32
    %c0_i32_0 = arith.constant 0 : i32
    %c0_i32_1 = arith.constant 0 : i32
    return %c0_i32, %c0_i32_0 : i32, i32
  }
  func.func @transform_4(%arg0: i32) -> (i32, i32) {
    %c0_i32 = arith.constant 0 : i32
    %c0_i32_0 = arith.constant 0 : i32
    %c0_i32_1 = arith.constant 0 : i32
    return %c0_i32, %c0_i32_0 : i32, i32
  }
  func.func @transform_5(%arg0: i32) -> (i32, i32) {
    %c0_i32 = arith.constant 0 : i32
    %c0_i32_0 = arith.constant 0 : i32
    return %arg0, %c0_i32 : i32, i32
  }
}

</mosaic_0001>

<bundles_post_ra>
// kernel: tpu_custom_call.1
= control target key start
LH: loop header
LB: loop body
LE: loop exit
PB: predicated region body
PF: predicated region fallthrough
CT: control target
= control target key end

     0   :  { %10 = vsyncpa [#allocation3], 0  ;;  %s851_s0 = inlined_call_operand.hbm [shape: bf16[8,128], index: 0, kind: input, shape index: {}]   ;;  %s852_s1 = inlined_call_operand.hbm [shape: f32[3,128], index: 1, kind: input, shape index: {}]   ;;  %s853_s2 = inlined_call_operand.hbm [shape: bf16[128,128], index: 2, kind: input, shape index: {}]   ;;  %s854_s3 = inlined_call_operand.hbm [shape: bf16[128,128], index: 3, kind: input, shape index: {}]   ;;  %s855_s4 = inlined_call_operand.hbm [shape: bf16[128,128], index: 4, kind: input, shape index: {}]   ;;  %s856_s5 = inlined_call_operand.hbm [shape: f32[8,128], index: 5, kind: output, shape index: {}]  }
   0x1   :  { %11 = vsyncpa [#allocation6], 0 }
   0x2   :  { %12 = vsyncpa [#allocation9], 0 }
   0x3   :  { %13 = vsyncpa [#allocation4], 0  ;;  %s754_s18 = smov [#allocation5]  }
   0x4   :  { %s30_s19 = sshll.u32 %s754_s18, 4  ;;  %s31_s19 = int_to_ptr.vmem [resolvable:$true] %s30_s19 }
   0x5   :  { %s634_s20 = scalar_lea.vmem %s31_s19, 64  ;;  %p639_p1 = scmp.lt.s32.totalorder %s31_s19, %s31_s19 }
   0x6   :  { %p635_p0 = scmp.ne.s32.totalorder %s31_s19, %s634_s20  ;;  %p640_p2 = scmp.lt.s32.totalorder %s634_s20, %s634_s20 }
   0x8   :  { %p641_p3 = por %p640_p2, %p639_p1 }
   0xa   :  { %p642_p4 = pnand %p641_p3, %p635_p0 }
   0xc   :  { %645 = shalt.err (!%p642_p4)
}
   0xd   :  { %33 = dma.hbm_to_vmem [thread:$0]  %s852_s1, 64, %s31_s19, [#allocation6]  }
   0xe   :  { %s755_s23 = smov [#allocation8]   ;;  %s756_s25 = smov [#allocation2]  }
   0xf   :  { %s51_s24 = sshll.u32 %s755_s23, 4  ;;  %s20_s26 = sshll.u32 %s756_s25, 4  ;;  %s52_s24 = int_to_ptr.vmem [resolvable:$true] %s51_s24  ;;  %s21_s26 = int_to_ptr.vmem [resolvable:$true] %s20_s26 }
  0x10   :  { %s654_s27 = scalar_lea.vmem %s52_s24, 1024  ;;  %p659_p6 = scmp.lt.s32.totalorder %s52_s24, %s52_s24 }
  0x11   :  { %p655_p5 = scmp.ne.s32.totalorder %s52_s24, %s654_s27  ;;  %p660_p7 = scmp.lt.s32.totalorder %s654_s27, %s654_s27 }
  0x13   :  { %p661_p8 = por %p660_p7, %p659_p6 }
  0x15   :  { %p662_p9 = pnand %p661_p8, %p655_p5 }
  0x17   :  { %665 = shalt.err (!%p662_p9)
}
  0x18   :  { %s757_s28 = smov 64   ;;  %s758_s29 = smov 4  }
  0x19   :  { %57 = dma.hbm_to_vmem [thread:$0]  %s854_s3, 1024, %s52_s24, [#allocation9], %s757_s28, %s757_s28, %s758_s29  }
  0x1a   :  { %s674_s1 = scalar_lea.vmem %s21_s26, 64  ;;  %p679_p11 = scmp.lt.s32.totalorder %s21_s26, %s21_s26 }
  0x1b   :  { %p675_p10 = scmp.ne.s32.totalorder %s21_s26, %s674_s1  ;;  %p680_p12 = scmp.lt.s32.totalorder %s674_s1, %s674_s1 }
  0x1d   :  { %p681_p13 = por %p680_p12, %p679_p11 }
  0x1f   :  { %p682_p0 = pnand %p681_p13, %p675_p10 }
  0x21   :  { %685 = shalt.err (!%p682_p0)
}
  0x22   :  { %23 = dma.hbm_to_vmem [thread:$0]  %s851_s0, 64, %s21_s26, [#allocation3]  }
  0x23   :  { %s759_s9 = smov [#allocation7]   ;;  %s760_s11 = smov [#allocation10]  }
  0x24   :  { %s39_s10 = sshll.u32 %s759_s9, 4  ;;  %s63_s12 = sshll.u32 %s760_s11, 4  ;;  %s40_s10 = int_to_ptr.vmem [resolvable:$true] %s39_s10  ;;  %s64_s12 = int_to_ptr.vmem [resolvable:$true] %s63_s12 }
  0x25   :  { %s694_s13 = scalar_lea.vmem %s40_s10, 1024  ;;  %p699_p2 = scmp.lt.s32.totalorder %s40_s10, %s40_s10 }
  0x26   :  { %p695_p1 = scmp.ne.s32.totalorder %s40_s10, %s694_s13  ;;  %p700_p3 = scmp.lt.s32.totalorder %s694_s13, %s694_s13 }
  0x28   :  { %p701_p4 = por %p700_p3, %p699_p2 }
  0x2a   :  { %p702_p5 = pnand %p701_p4, %p695_p1 }
  0x2c   :  { %705 = shalt.err (!%p702_p5)
}
  0x2d   :  { %45 = dma.hbm_to_vmem [thread:$0]  %s853_s2, 1024, %s40_s10, [#allocation6], %s757_s28, %s757_s28, %s758_s29  }
  0x2e   :  { %s714_s0 = scalar_lea.vmem %s64_s12, 1024  ;;  %p719_p7 = scmp.lt.s32.totalorder %s64_s12, %s64_s12 }
  0x2f   :  { %p715_p6 = scmp.ne.s32.totalorder %s64_s12, %s714_s0  ;;  %p720_p8 = scmp.lt.s32.totalorder %s714_s0, %s714_s0 }
  0x31   :  { %p721_p9 = por %p720_p8, %p719_p7 }
  0x33   :  { %p722_p10 = pnand %p721_p9, %p715_p6 }
  0x35   :  { %725 = shalt.err (!%p722_p10)
}
  0x36   :  { %69 = dma.hbm_to_vmem [thread:$0]  %s855_s4, 1024, %s64_s12, [#allocation9], %s757_s28, %s757_s28, %s758_s29  }
  0x37   :  { %746 = dma.done.wait [#allocation3], 64  }
  0x38   :  { %747 = vsyncadd [#allocation3], 4294967232 }
  0x39   :  { %748 = dma.done.wait [#allocation6], 1088  }
  0x3a   :  { %749 = vsyncadd [#allocation6], 4294966208 }
  0x3b   :  { %750 = dma.done.wait [#allocation9], 2048  }
  0x3c   :  { %751 = vsyncadd [#allocation9], 4294965248  ;;  %v761_v0 = vmov 0.0   ;;  %vm762_vm0 = vmmov 0   ;;  %v594_v1 = vld [vmem:[#allocation7 + $0x38] sm:$0xff]   ;;  %v595_v2 = vld [vmem:[#allocation7 + $0x30] sm:$0xff]  }
  0x3d   :  { %524 = vmatprep.subr.bf16.mxu0 %v761_v0  ;;  %540 = vmatprep.mubr.msk.bf16.mxu0 %vm762_vm0, %v761_v0  ;;  %v602_v3 = vld [vmem:[#allocation8 + $0x38] sm:$0xff]   ;;  %v596_v4 = vld [vmem:[#allocation7 + $0x28] sm:$0xff]   ;;  %v603_v5 = vld [vmem:[#allocation8 + $0x30] sm:$0xff]   ;;  %s763_s2 = smov [#allocation11]  }
  0x3e   :  { %544 = vmatprep.subr.bf16.mxu1 %v761_v0  ;;  %560 = vmatprep.mubr.msk.bf16.mxu1 %vm762_vm0, %v761_v0  ;;  %v597_v6 = vld [vmem:[#allocation7 + $0x20] sm:$0xff]   ;;  %v598_v7 = vld [vmem:[#allocation7 + $0x18] sm:$0xff]   ;;  %v599_v8 = vld [vmem:[#allocation7 + $0x10] sm:$0xff]   ;;  %s459_s4 = sshll.u32 %s763_s2, 4  ;;  %s460_s4 = int_to_ptr.vmem [resolvable:$true] %s459_s4 }
  0x3f   :  { %525 = vmatpush3.bf16.xpose.msra.mxu0 %v594_v1  ;;  %545 = vmatpush3.bf16.xpose.msra.mxu1 %v602_v3  ;;  %v600_v9 = vld [vmem:[#allocation7 + $0x8] sm:$0xff]   ;;  %v601_v10 = vld [vmem:[#allocation7] sm:$0xff]   ;;  %v86_v11 = vld [vmem:[#allocation2] sm:$0xf]  ;;  %s726_s17 = scalar_lea.vmem %s460_s4, 128  ;;  %p731_p12 = scmp.lt.s32.totalorder %s460_s4, %s460_s4 }
  0x40   :  { %526 = vmatprep.subr.bf16.mxu0 %v761_v0  ;;  %546 = vmatprep.subr.bf16.mxu1 %v761_v0  ;;  %v604_v12 = vld [vmem:[#allocation8 + $0x28] sm:$0xff]   ;;  %v605_v13 = vld [vmem:[#allocation8 + $0x20] sm:$0xff]   ;;  %v606_v14 = vld [vmem:[#allocation8 + $0x18] sm:$0xff]   ;;  %p727_p11 = scmp.ne.s32.totalorder %s460_s4, %s726_s17  ;;  %p732_p13 = scmp.lt.s32.totalorder %s726_s17, %s726_s17 }
  0x41   :  { %v607_v15 = vld [vmem:[#allocation8 + $0x10] sm:$0xff]   ;;  %v608_v16 = vld [vmem:[#allocation8 + $0x8] sm:$0xff]   ;;  %v609_v17 = vld [vmem:[#allocation8] sm:$0xff]  }
  0x42   :  { %v610_v18 = vld [vmem:[#allocation10 + $0x38] sm:$0xff]   ;;  %v611_v19 = vld [vmem:[#allocation10 + $0x30] sm:$0xff]   ;;  %v612_v42 = vld [vmem:[#allocation10 + $0x28] sm:$0xff]   ;;  %p733_p0 = por %p732_p13, %p731_p12 }
  0x43   :  { %v470_v20 = vld [vmem:[#allocation5] ss:$0 sm:$0xff]  ;;  %v613_v43 = vld [vmem:[#allocation10 + $0x20] sm:$0xff]   ;;  %v615_v45 = vld [vmem:[#allocation10 + $0x10] sm:$0xff]  }
  0x44   :  { %v614_v44 = vld [vmem:[#allocation10 + $0x18] sm:$0xff]   ;;  %v616_v46 = vld [vmem:[#allocation10 + $0x8] sm:$0xff]   ;;  %v617_v47 = vld [vmem:[#allocation10] sm:$0xff]   ;;  %p734_p1 = pnand %p733_p0, %p727_p11 }
  0x45   :  { %v479_v48 = vld [vmem:[#allocation5 + $0x1] ss:$0 sm:$0xff] }
  0x47   :  { %527 = vmatpush3.bf16.xpose.msra.mxu0 %v595_v2  ;;  %547 = vmatpush3.bf16.xpose.msra.mxu1 %v603_v5 }
  0x48   :  { %528 = vmatprep.subr.bf16.mxu0 %v761_v0  ;;  %548 = vmatprep.subr.bf16.mxu1 %v761_v0 }
  0x4f   :  { %529 = vmatpush3.bf16.xpose.msra.mxu0 %v596_v4  ;;  %549 = vmatpush3.bf16.xpose.msra.mxu1 %v604_v12 }
  0x50   :  { %530 = vmatprep.subr.bf16.mxu0 %v761_v0  ;;  %550 = vmatprep.subr.bf16.mxu1 %v761_v0 }
  0x57   :  { %531 = vmatpush3.bf16.xpose.msra.mxu0 %v597_v6  ;;  %551 = vmatpush3.bf16.xpose.msra.mxu1 %v605_v13  ;;  %v488_v6 = vld [vmem:[#allocation5 + $0x2] ss:$0 sm:$0xff] }
  0x58   :  { %532 = vmatprep.subr.bf16.mxu0 %v761_v0  ;;  %552 = vmatprep.subr.bf16.mxu1 %v761_v0 }
  0x5f   :  { %533 = vmatpush3.bf16.xpose.msra.mxu0 %v598_v7  ;;  %553 = vmatpush3.bf16.xpose.msra.mxu1 %v606_v14 }
  0x60   :  { %534 = vmatprep.subr.bf16.mxu0 %v761_v0  ;;  %554 = vmatprep.subr.bf16.mxu1 %v761_v0 }
  0x67   :  { %535 = vmatpush3.bf16.xpose.msra.mxu0 %v599_v8  ;;  %555 = vmatpush3.bf16.xpose.msra.mxu1 %v607_v15 }
  0x68   :  { %536 = vmatprep.subr.bf16.mxu0 %v761_v0  ;;  %556 = vmatprep.subr.bf16.mxu1 %v761_v0 }
  0x6f   :  { %537 = vmatpush3.bf16.xpose.msra.mxu0 %v600_v9  ;;  %557 = vmatpush3.bf16.xpose.msra.mxu1 %v608_v16 }
  0x70   :  { %538 = vmatprep.subr.bf16.mxu0 %v761_v0  ;;  %558 = vmatprep.subr.bf16.mxu1 %v761_v0 }
  0x77   :  { %539 = vmatpush3.bf16.xpose.msra.mxu0 %v601_v10  ;;  %559 = vmatpush3.bf16.xpose.msra.mxu1 %v609_v17 }
  0x78   :  { %564 = vmatprep.subr.bf16.mxu0 %v761_v0 }
  0x7e   :  { %541 = vmatmul.mubr.bf16.vlgmr.msra.gmra.mxu0 %v86_v11 }
  0x7f   :  { %580 = vmatprep.mubr.msk.bf16.mxu0 %vm762_vm0, %v761_v0  ;;  %565 = vmatpush3.bf16.xpose.msra.mxu0 %v610_v18 }
  0x80   :  { %566 = vmatprep.subr.bf16.mxu0 %v761_v0 }
  0x87   :  { %567 = vmatpush3.bf16.xpose.msra.mxu0 %v611_v19 }
  0x88   :  { %568 = vmatprep.subr.bf16.mxu0 %v761_v0 }
  0x8f   :  { %569 = vmatpush3.bf16.xpose.msra.mxu0 %v612_v42 }
  0x90   :  { %570 = vmatprep.subr.bf16.mxu0 %v761_v0 }
  0x97   :  { %571 = vmatpush3.bf16.xpose.msra.mxu0 %v613_v43 }
  0x98   :  { %572 = vmatprep.subr.bf16.mxu0 %v761_v0 }
  0x9f   :  { %573 = vmatpush3.bf16.xpose.msra.mxu0 %v614_v44 }
  0xa0   :  { %574 = vmatprep.subr.bf16.mxu0 %v761_v0 }
  0xa7   :  { %575 = vmatpush3.bf16.xpose.msra.mxu0 %v615_v45 }
  0xa8   :  { %576 = vmatprep.subr.bf16.mxu0 %v761_v0 }
  0xaf   :  { %577 = vmatpush3.bf16.xpose.msra.mxu0 %v616_v46 }
  0xb0   :  { %578 = vmatprep.subr.bf16.mxu0 %v761_v0 }
  0xb7   :  { %579 = vmatpush3.bf16.xpose.msra.mxu0 %v617_v47 }
 0x13e   :  { %v190_v21 = vpop.f32.mrf.mxu0 }
 0x13f   :  { %v191_v22 = vadd.f32 %v470_v20, %v190_v21 }
 0x140   :  { %v542_v23 = vpop.f32.mrf.mxu0 }
 0x141   :  { %v199_v24 = vand.u32 2147483647, %v191_v22  ;;  %v196_v37 = vmax.f32 %v191_v22, 0.0  ;;  %vm197_vm2 = vcmp.ne.f32.partialorder %v191_v22, %v191_v22 }
 0x142   :  { %v193_v25 = vpop.f32.mrf.mxu0 }
 0x143   :  { %v200_v26 = vsub.f32 0.0, %v199_v24 }
 0x144   :  { %v543_v27 = vpop.f32.mrf.mxu0 }
 0x145   :  { %v201_v28 = vmul.f32 1.442695, %v200_v26 }
 0x147   :  { %618 = vpow2.f32 %v201_v28 }
 0x154   :  { %v619_v29 = vpop.eup %618 }
 0x155   :  { %v203_v30 = vadd.f32 1.0, %v619_v29  ;;  %v206_v31 = vmul.f32 -0.5, %v619_v29  ;;  %v209_v33 = vand.u32 2147483647, %v619_v29 }
 0x157   :  { %620 = vlog2.f32 %v203_v30  ;;  %v207_v32 = vadd.f32 1.0, %v206_v31  ;;  %vm210_vm1 = vcmp.lt.f32.partialorder %v209_v33, 0.0004427343 }
 0x159   :  { %v208_v36 = vmul.f32 %v619_v29, %v207_v32 }
 0x164   :  { %v621_v34 = vpop.eup %620 }
 0x165   :  { %v205_v35 = vmul.f32 0.6931472, %v621_v34 }
 0x167   :  { %v211_v38 = vsel %vm210_vm1, %v208_v36, %v205_v35 }
 0x168   :  { %v212_v39 = vadd.f32 %v211_v38, %v196_v37 }
 0x16a   :  { %v213_v40 = vsel %vm197_vm2, %v191_v22, %v212_v39 }
 0x16b   :  { %v230_v41 = vpack.c.bf16 %v213_v40, %v213_v40 }
 0x16d   :  { %561 = vmatmul.mubr.bf16.vlgmr.msra.gmra.mxu1 %v230_v41 }
 0x22d   :  { %v318_v49 = vpop.f32.mrf.mxu1 }
 0x22e   :  { %v319_v50 = vadd.f32 %v479_v48, %v318_v49 }
 0x22f   :  { %v562_v51 = vpop.f32.mrf.mxu1 }
 0x230   :  { %v327_v52 = vand.u32 2147483647, %v319_v50  ;;  %v324_v1 = vmax.f32 %v319_v50, 0.0  ;;  %vm325_vm4 = vcmp.ne.f32.partialorder %v319_v50, %v319_v50 }
 0x231   :  { %v321_v53 = vpop.f32.mrf.mxu1 }
 0x232   :  { %v328_v54 = vsub.f32 0.0, %v327_v52 }
 0x233   :  { %v563_v55 = vpop.f32.mrf.mxu1 }
 0x234   :  { %v329_v56 = vmul.f32 1.442695, %v328_v54 }
 0x236   :  { %622 = vpow2.f32 %v329_v56 }
 0x243   :  { %v623_v57 = vpop.eup %622 }
 0x244   :  { %v331_v58 = vadd.f32 1.0, %v623_v57  ;;  %v334_v59 = vmul.f32 -0.5, %v623_v57  ;;  %v337_v61 = vand.u32 2147483647, %v623_v57 }
 0x246   :  { %624 = vlog2.f32 %v331_v58  ;;  %v335_v60 = vadd.f32 1.0, %v334_v59  ;;  %vm338_vm3 = vcmp.lt.f32.partialorder %v337_v61, 0.0004427343 }
 0x248   :  { %v336_v0 = vmul.f32 %v623_v57, %v335_v60 }
 0x253   :  { %v625_v62 = vpop.eup %624 }
 0x254   :  { %v333_v63 = vmul.f32 0.6931472, %v625_v62 }
 0x256   :  { %v339_v2 = vsel %vm338_vm3, %v336_v0, %v333_v63 }
 0x257   :  { %v340_v3 = vadd.f32 %v339_v2, %v324_v1 }
 0x259   :  { %v341_v4 = vsel %vm325_vm4, %v319_v50, %v340_v3 }
 0x25a   :  { %v358_v5 = vpack.c.bf16 %v341_v4, %v341_v4 }
 0x25c   :  { %581 = vmatmul.mubr.bf16.vlgmr.msra.gmra.mxu0 %v358_v5 }
 0x31c   :  { %v446_v7 = vpop.f32.mrf.mxu0 }
 0x31d   :  { %v447_v8 = vadd.f32 %v488_v6, %v446_v7 }
 0x31e   :  { %v582_v9 = vpop.f32.mrf.mxu0 }
 0x31f   :  { %452 = vst [vmem:[#allocation11] sm:$0xff] %v447_v8 }
 0x320   :  { %v449_v10 = vpop.f32.mrf.mxu0 }
 0x321   :  { %737 = shalt.err (!%p734_p1)
}
 0x322   :  { %462 = dma.vmem_to_hbm [thread:$0]  %s460_s4, 128, %s856_s5, [#allocation4]   ;;  %v583_v11 = vpop.f32.mrf.mxu0 }
 0x323   :  { %752 = dma.done.wait [#allocation4], 128  }
 0x324   :  { %753 = vsyncadd [#allocation4], 4294967168 }
 0x325   :  { %466 = vsyncpa [#allocation3], 1 }
 0x326   :  { %467 = vsyncpa [#allocation6], 1 }
 0x327   :  { %468 = vsyncpa [#allocation9], 1 }
 0x328   :  { %469 = vsyncpa [#allocation4], 1 }

</bundles_post_ra>
